<compile_context>
chip_gen: v5e
topology: v5e:2x2
jax: 0.10.0
libtpu: 0.0.40
codegen_flags: <defaults>
</compile_context>

<pallas_src>
import functools

import jax
import jax.numpy as jnp
from jax import lax
from jax.experimental import pallas as pl
from jax.experimental.pallas import tpu as pltpu

# ---- small, TPU-friendly stand-ins for the module's sizes ----
EMBED_SIZE = 256        # transformer hidden_size (wav2vec2-base would be 768)
SEGNET_MIDSIZE = 128
NUM_LABELS = 8
SEQ_LEN = 16
BATCH = 16

LANE = 128
SUBLANE_BF16 = 16       # bf16 packs 16 rows per sublane tile
POOL_CHUNK = 16         # S rows reduced per streaming-pool iteration


def segment_head_kernel(h_ref, w1_ref, b1_ref, w2_ref, b2_ref, o_ref, *,
                        inv_s, chunk):
    # h_ref : (TB, S_pad, H)  bf16   transformer last_hidden_state tile
    # w1_ref: (H, MID)        bf16   projector weight (pre-transposed)
    # b1_ref: (1, MID)        f32
    # w2_ref: (MID, F_pad)    bf16   classifier weight, zero-padded to 128 lanes
    # b2_ref: (1, F_pad)      f32    zero-padded
    # o_ref : (TB, F_pad)            lane-dense output block (unmasked stores)
    tb, s_pad, hdim = h_ref.shape
    n_chunks = s_pad // chunk

    # ---- streaming mean-pool over the sequence axis (f32 accumulate) ----
    # Only a (TB, chunk, H) slice is cast to f32 at a time; carry is (TB, H).
    def body(c, acc):
        s0 = pl.multiple_of(c * chunk, chunk)
        blk = h_ref[:, pl.ds(s0, chunk), :].astype(jnp.float32)
        return acc + jnp.sum(blk, axis=1)

    pooled = lax.fori_loop(0, n_chunks, body,
                           jnp.zeros((tb, hdim), jnp.float32),
                           unroll=(n_chunks <= 8)) * inv_s          # (TB, H)

    # ---- projector: Linear(H -> MID) + ReLU (bf16 MXU, f32 accumulate) ----
    h1 = jnp.dot(pooled.astype(jnp.bfloat16), w1_ref[...],
                 preferred_element_type=jnp.float32)
    h1 = jnp.maximum(h1 + b1_ref[...], 0.0)                         # (TB, MID)

    # ---- classifier: Linear(MID -> F_pad); padded columns are zeros ----
    out = jnp.dot(h1.astype(jnp.bfloat16), w2_ref[...],
                  preferred_element_type=jnp.float32)
    o_ref[...] = (out + b2_ref[...]).astype(o_ref.dtype)


def _round_up(x, m):
    return ((x + m - 1) // m) * m


def _pick_tile_b(B, act_bytes_per_row, max_rows_in_vmem):
    """Work-aware batch tile (must divide B).

    Small problems: one grid step (per-step overhead dominates, nothing to
    overlap).  Large problems: >= ~1 MiB of activations per step, an even grid
    of >= 4 steps (v7x megacore + pipeline steady state), preferring
    tile_b % 128 == 0 (fills v5e MXU M passes), all within the VMEM budget.
    """
    max_rows_in_vmem = max(1, max_rows_in_vmem)
    if B <= max_rows_in_vmem and B * act_bytes_per_row <= (2 << 20):
        return B                                   # tiny problem: single step
    min_rows = max(1, -(-(1 << 20) // act_bytes_per_row))   # ~1 MiB per step
    divisors = [d for d in range(1, B + 1) if B % d == 0]
    feasible = [d for d in divisors
                if d <= max_rows_in_vmem and d >= min_rows
                and (B // d) >= 4 and (B // d) % 2 == 0]
    if feasible:
        mult128 = [d for d in feasible if d % 128 == 0]
        return max(mult128) if mult128 else max(feasible)
    fitting = [d for d in divisors if d <= max_rows_in_vmem]
    return max(fitting) if fitting else 1


def segment_network_head(hidden_states, w1, b1, w2, b2, *, tile_b=None,
                         out_dtype=jnp.float32):
    """hidden_states: [B, S, H]; w1: [H, MID]; b1: [MID] or [1, MID];
    w2: [MID, F_out]; b2: [F_out] or [1, F_out].  Returns [B, F_out]."""
    B, S, H = hidden_states.shape
    MID = w1.shape[1]
    F_out = w2.shape[1]
    F_pad = _round_up(F_out, LANE)          # lane-dense output -> unmasked vst
    S_pad = _round_up(S, SUBLANE_BF16)      # bf16 sublane tiling on the S dim
    out_bytes = jnp.dtype(out_dtype).itemsize

    # ---- generation-aware VMEM budget (75% of physical leaves headroom) ----
    try:
        vmem_cap = int(pltpu.get_tpu_info().vmem_capacity_bytes)
    except Exception:                        # fall back to v7x-sized capacity
        vmem_cap = 64 * 1024 * 1024
    vmem_budget = int(0.75 * vmem_cap)

    act_bytes_per_row = S_pad * H * 2                      # bf16 activations
    per_row = (2 * act_bytes_per_row                       # input, 2 buffers
               + 2 * F_pad * out_bytes                     # output, 2 buffers
               + (H + MID) * 4)                            # pooled/h1 f32 state
    resident = 2 * ((H * MID + MID * F_pad) * 2            # bf16 weights
                    + (MID + F_pad) * 4)                   # f32 biases (x2 bufs)
    slack = 2 * 1024 * 1024                                # compiler scratch
    max_rows = (vmem_budget - resident - slack) // per_row

    if tile_b is None:
        tile_b = _pick_tile_b(B, act_bytes_per_row, max_rows)
    assert B % tile_b == 0, (B, tile_b)
    grid = (B // tile_b,)

    # bf16 streaming of activations & weights; biases/accumulation stay f32.
    h_bf16 = hidden_states.astype(jnp.bfloat16)
    if S_pad != S:   # keep DMAs rectangular at ragged real-world seq lengths
        h_bf16 = jnp.pad(h_bf16, ((0, 0), (0, S_pad - S), (0, 0)))
    w1_bf16 = w1.astype(jnp.bfloat16)
    b1_f32 = b1.reshape(1, MID).astype(jnp.float32)
    w2_pad = jnp.zeros((MID, F_pad), jnp.bfloat16).at[:, :F_out].set(
        w2.astype(jnp.bfloat16))
    b2_pad = jnp.zeros((1, F_pad), jnp.float32).at[:, :F_out].set(
        b2.reshape(1, F_out).astype(jnp.float32))

    needed = tile_b * per_row + resident + slack
    vmem_limit = int(min(vmem_budget, max(2 * needed, 16 * 1024 * 1024)))

    cost = pl.CostEstimate(
        flops=B * S_pad * H + 2 * B * (H * MID + MID * F_pad),
        transcendentals=0,
        bytes_accessed=(B * S_pad * H * 2 + B * F_pad * out_bytes
                        + (H * MID + MID * F_pad) * 2 + (MID + F_pad) * 4),
    )

    kernel = functools.partial(segment_head_kernel, inv_s=1.0 / S,
                               chunk=min(POOL_CHUNK, S_pad))

    out_padded = pl.pallas_call(
        kernel,
        out_shape=jax.ShapeDtypeStruct((B, F_pad), out_dtype),
        grid_spec=pltpu.PrefetchScalarGridSpec(
            num_scalar_prefetch=0,
            grid=grid,
            in_specs=[
                pl.BlockSpec((tile_b, S_pad, H), lambda i: (i, 0, 0)),  # acts
                pl.BlockSpec((H, MID), lambda i: (0, 0)),       # w1 resident
                pl.BlockSpec((1, MID), lambda i: (0, 0)),       # b1 resident
                pl.BlockSpec((MID, F_pad), lambda i: (0, 0)),   # w2 resident
                pl.BlockSpec((1, F_pad), lambda i: (0, 0)),     # b2 resident
            ],
            out_specs=pl.BlockSpec((tile_b, F_pad), lambda i: (i, 0)),
        ),
        compiler_params=pltpu.CompilerParams(
            dimension_semantics=("parallel",),
            vmem_limit_bytes=vmem_limit,
        ),
        cost_estimate=cost,
    )(h_bf16, w1_bf16, b1_f32, w2_pad, b2_pad)

    return out_padded[:, :F_out]


def init_params(key):
    """Deterministic init mimicking nn.Linear uniform(-1/sqrt(fan_in), +1/sqrt(fan_in))."""
    k1, k2, k3, k4 = jax.random.split(key, 4)
    lim1 = 1.0 / (EMBED_SIZE ** 0.5)
    lim2 = 1.0 / (SEGNET_MIDSIZE ** 0.5)
    w1 = jax.random.uniform(k1, (EMBED_SIZE, SEGNET_MIDSIZE), jnp.float32, -lim1, lim1)
    b1 = jax.random.uniform(k2, (1, SEGNET_MIDSIZE), jnp.float32, -lim1, lim1)
    w2 = jax.random.uniform(k3, (SEGNET_MIDSIZE, NUM_LABELS), jnp.float32, -lim2, lim2)
    b2 = jax.random.uniform(k4, (1, NUM_LABELS), jnp.float32, -lim2, lim2)
    return w1, b1, w2, b2


def reference(hidden_states, w1, b1, w2, b2):
    """Same bf16 streaming path as the kernel, in plain JAX."""
    h = hidden_states.astype(jnp.bfloat16)
    pooled = jnp.mean(h.astype(jnp.float32), axis=1)
    h1 = jnp.dot(pooled.astype(jnp.bfloat16), w1.astype(jnp.bfloat16),
                 preferred_element_type=jnp.float32) + b1.reshape(1, -1)
    h1 = jnp.maximum(h1, 0.0)
    out = jnp.dot(h1.astype(jnp.bfloat16), w2.astype(jnp.bfloat16),
                  preferred_element_type=jnp.float32) + b2.reshape(1, -1)
    return out


if __name__ == "__main__":
    key = jax.random.PRNGKey(0)
    kh, kp = jax.random.split(key)
    hidden_states = jax.random.normal(kh, (BATCH, SEQ_LEN, EMBED_SIZE), jnp.float32)
    w1, b1, w2, b2 = init_params(kp)

    out = segment_network_head(hidden_states, w1, b1, w2, b2)
    out = jax.block_until_ready(out)

    ref = reference(hidden_states, w1, b1, w2, b2)
    assert out.shape == (BATCH, NUM_LABELS), out.shape
    assert jnp.allclose(out, ref, atol=1e-2, rtol=1e-2)
    print("KERNEL_OK")
</pallas_src>

<mosaic_0001>
module attributes {stable_mosaic.version = 11 : i64} {
  func.func @segment_head_kernel(%arg0: i32, %arg1: memref<16x16x256xbf16, #tpu.memory_space<vmem>>, %arg2: memref<256x128xbf16, #tpu.memory_space<vmem>>, %arg3: memref<1x128xf32, #tpu.memory_space<vmem>>, %arg4: memref<128x128xbf16, #tpu.memory_space<vmem>>, %arg5: memref<1x128xf32, #tpu.memory_space<vmem>>, %arg6: memref<16x128xf32, #tpu.memory_space<vmem>>) attributes {dimension_semantics = [#tpu.dimension_semantics<parallel>], iteration_bounds = array<i64: 1>, scalar_prefetch = 0 : i64, scratch_operands = 0 : i64, tpu.core_type = #tpu.core_type<tc>, window_params = [{transform_indices = @transform_0, window_bounds = array<i64: 16, 16, 256>}, {pipeline_mode = #tpu.pipeline_mode<synchronous>, transform_indices = @transform_1, window_bounds = array<i64: 256, 128>}, {pipeline_mode = #tpu.pipeline_mode<synchronous>, transform_indices = @transform_2, window_bounds = array<i64: 1, 128>}, {pipeline_mode = #tpu.pipeline_mode<synchronous>, transform_indices = @transform_3, window_bounds = array<i64: 128, 128>}, {pipeline_mode = #tpu.pipeline_mode<synchronous>, transform_indices = @transform_4, window_bounds = array<i64: 1, 128>}, {transform_indices = @transform_5, window_bounds = array<i64: 16, 128>}]} {
    %cst = arith.constant 0.000000e+00 : f32
    %0 = vector.broadcast %cst : f32 to vector<16x256xf32>
    %c0_i32 = arith.constant 0 : i32
    %c16_i32 = arith.constant 16 : i32
    %1 = arith.muli %c0_i32, %c16_i32 : i32
    %2 = tpu.assume_multiple %1, 16 : i32
    %c0 = arith.constant 0 : index
    %3 = arith.index_cast %2 : i32 to index
    %c0_0 = arith.constant 0 : index
    %4 = vector.load %arg1[%c0, %3, %c0_0] : memref<16x16x256xbf16, #tpu.memory_space<vmem>>, vector<16x16x256xbf16>
    %5 = arith.extf %4 : vector<16x16x256xbf16> to vector<16x16x256xf32>
    %cst_1 = arith.constant dense<0.000000e+00> : vector<16x256xf32>
    %6 = vector.multi_reduction <add>, %5, %cst_1 [1] : vector<16x16x256xf32> to vector<16x256xf32>
    %7 = arith.addf %0, %6 : vector<16x256xf32>
    %c1_i32 = arith.constant 1 : i32
    %cst_2 = arith.constant 6.250000e-02 : f32
    %8 = vector.broadcast %cst_2 : f32 to vector<16x256xf32>
    %9 = arith.mulf %7, %8 : vector<16x256xf32>
    %10 = arith.truncf %9 : vector<16x256xf32> to vector<16x256xbf16>
    %c0_3 = arith.constant 0 : index
    %c0_4 = arith.constant 0 : index
    %11 = vector.load %arg2[%c0_3, %c0_4] : memref<256x128xbf16, #tpu.memory_space<vmem>>, vector<256x128xbf16>
    %cst_5 = arith.constant dense<0.000000e+00> : vector<16x128xf32>
    %12 = tpu.matmul %10, %11, %cst_5 {dimension_numbers = #tpu.dot_dimension_numbers<[1], [0], [0], [1], [0, 0, 1, 1], [], []>} : vector<16x256xbf16>, vector<256x128xbf16>, vector<16x128xf32> -> vector<16x128xf32>
    %c0_6 = arith.constant 0 : index
    %c0_7 = arith.constant 0 : index
    %13 = vector.load %arg3[%c0_6, %c0_7] : memref<1x128xf32, #tpu.memory_space<vmem>>, vector<1x128xf32>
    %14 = vector.broadcast %13 : vector<1x128xf32> to vector<16x128xf32>
    %15 = arith.addf %12, %14 : vector<16x128xf32>
    %cst_8 = arith.constant 0.000000e+00 : f32
    %16 = vector.broadcast %cst_8 : f32 to vector<16x128xf32>
    %17 = arith.maximumf %15, %16 : vector<16x128xf32>
    %18 = arith.truncf %17 : vector<16x128xf32> to vector<16x128xbf16>
    %c0_9 = arith.constant 0 : index
    %c0_10 = arith.constant 0 : index
    %19 = vector.load %arg4[%c0_9, %c0_10] : memref<128x128xbf16, #tpu.memory_space<vmem>>, vector<128x128xbf16>
    %cst_11 = arith.constant dense<0.000000e+00> : vector<16x128xf32>
    %20 = tpu.matmul %18, %19, %cst_11 {dimension_numbers = #tpu.dot_dimension_numbers<[1], [0], [0], [1], [0, 0, 1, 1], [], []>} : vector<16x128xbf16>, vector<128x128xbf16>, vector<16x128xf32> -> vector<16x128xf32>
    %c0_12 = arith.constant 0 : index
    %c0_13 = arith.constant 0 : index
    %21 = vector.load %arg5[%c0_12, %c0_13] : memref<1x128xf32, #tpu.memory_space<vmem>>, vector<1x128xf32>
    %22 = vector.broadcast %21 : vector<1x128xf32> to vector<16x128xf32>
    %23 = arith.addf %20, %22 : vector<16x128xf32>
    %c0_14 = arith.constant 0 : index
    %c0_15 = arith.constant 0 : index
    %24 = vector.load %arg6[%c0_14, %c0_15] : memref<16x128xf32, #tpu.memory_space<vmem>>, vector<16x128xf32>
    tpu.vector_store %arg6[%c0_14, %c0_15], %23 {strides = array<i32>} : memref<16x128xf32, #tpu.memory_space<vmem>>, vector<16x128xf32>,
    return
  }
  func.func @transform_0(%arg0: i32) -> (i32, i32, i32) {
    %c0_i32 = arith.constant 0 : i32
    %c0_i32_0 = arith.constant 0 : i32
    %c0_i32_1 = arith.constant 0 : i32
    return %arg0, %c0_i32, %c0_i32_0 : i32, i32, i32
  }
  func.func @transform_1(%arg0: i32) -> (i32, i32) {
    %c0_i32 = arith.constant 0 : i32
    %c0_i32_0 = arith.constant 0 : i32
    %c0_i32_1 = arith.constant 0 : i32
    return %c0_i32, %c0_i32_0 : i32, i32
  }
  func.func @transform_2(%arg0: i32) -> (i32, i32) {
    %c0_i32 = arith.constant 0 : i32
    %c0_i32_0 = arith.constant 0 : i32
    %c0_i32_1 = arith.constant 0 : i32
    return %c0_i32, %c0_i32_0 : i32, i32
  }
  func.func @transform_3(%arg0: i32) -> (i32, i32) {
    %c0_i32 = arith.constant 0 : i32
    %c0_i32_0 = arith.constant 0 : i32
    %c0_i32_1 = arith.constant 0 : i32
    return %c0_i32, %c0_i32_0 : i32, i32
  }
  func.func @transform_4(%arg0: i32) -> (i32, i32) {
    %c0_i32 = arith.constant 0 : i32
    %c0_i32_0 = arith.constant 0 : i32
    %c0_i32_1 = arith.constant 0 : i32
    return %c0_i32, %c0_i32_0 : i32, i32
  }
  func.func @transform_5(%arg0: i32) -> (i32, i32) {
    %c0_i32 = arith.constant 0 : i32
    %c0_i32_0 = arith.constant 0 : i32
    return %arg0, %c0_i32 : i32, i32
  }
}

</mosaic_0001>

<bundles_post_ra>
// kernel: tpu_custom_call.1
= control target key start
LH: loop header
LB: loop body
LE: loop exit
PB: predicated region body
PF: predicated region fallthrough
CT: control target
= control target key end

     0   :  { %10 = vsyncpa [#allocation3], 0  ;;  %s1393_s0 = inlined_call_operand.hbm [shape: bf16[16,16,256], index: 0, kind: input, shape index: {}]   ;;  %s1394_s1 = inlined_call_operand.hbm [shape: bf16[256,128], index: 1, kind: input, shape index: {}]   ;;  %s1395_s2 = inlined_call_operand.vmem [shape: f32[1,128], index: 2, kind: input, shape index: {}]   ;;  %s1396_s3 = inlined_call_operand.hbm [shape: bf16[128,128], index: 3, kind: input, shape index: {}]   ;;  %s1397_s4 = inlined_call_operand.vmem [shape: f32[1,128], index: 4, kind: input, shape index: {}]   ;;  %s1398_s5 = inlined_call_operand.hbm [shape: f32[16,128], index: 5, kind: output, shape index: {}]  }
   0x1   :  { %11 = vsyncpa [#allocation6], 0  ;;  %s30_s20 = sshll.u32 %s1394_s1, 4  ;;  %s31_s20 = int_to_ptr.hbm [resolvable:$true] %s30_s20 }
   0x2   :  { %12 = vsyncpa [#allocation4], 0  ;;  %s1089_s21 = smov [#allocation5]   ;;  %s17_s25 = sshll.u32 %s1393_s0, 4  ;;  %s18_s25 = int_to_ptr.hbm [resolvable:$true] %s17_s25 }
   0x3   :  { %s32_s22 = sshll.u32 %s1089_s21, 4  ;;  %s1090_s26 = smov 64   ;;  %s33_s22 = int_to_ptr.vmem [resolvable:$true] %s32_s22 }
   0x4   :  { %s1091_s27 = smov 4   ;;  %s1092_s28 = smov [#allocation2]  }
   0x5   :  { %38 = dma.hbm_to_vmem [thread:$0]  %s31_s20, 2048, %s33_s22, [#allocation6], %s1090_s26, %s1090_s26, %s1091_s27  }
   0x6   :  { %s19_s29 = sshll.u32 %s1092_s28, 4  ;;  %s1093_s30 = smov 128   ;;  %s20_s29 = int_to_ptr.vmem [resolvable:$true] %s19_s29 }
   0x7   :  { %s1094_s6 = smov 8   ;;  %s45_s8 = sshll.u32 %s1396_s3, 4  ;;  %s46_s8 = int_to_ptr.hbm [resolvable:$true] %s45_s8 }
   0x8   :  { %25 = dma.hbm_to_vmem [thread:$0]  %s18_s25, 4096, %s20_s29, [#allocation3], %s1093_s30, %s1093_s30, %s1094_s6  }
   0x9   :  { %s1095_s9 = smov [#allocation7]  }
   0xa   :  { %s47_s0 = sshll.u32 %s1095_s9, 4  ;;  %s48_s0 = int_to_ptr.vmem [resolvable:$true] %s47_s0 }
   0xb   :  { %53 = dma.hbm_to_vmem [thread:$0]  %s46_s8, 1024, %s48_s0, [#allocation6], %s1090_s26, %s1090_s26, %s1091_s27  }
   0xc   :  { %1083 = dma.done.wait [#allocation3], 4096  }
   0xd   :  { %1084 = vsyncadd [#allocation3], 4294963200 }
   0xe   :  { %1085 = dma.done.wait [#allocation6], 3072  }
   0xf   :  { %1086 = vsyncadd [#allocation6], 4294964224  ;;  %v960_v0 = vld [vmem:[#allocation5 + $0x38] sm:$0xff]  ;;  %v959_v2 = vld [vmem:[#allocation5 + $0x30] sm:$0xff]  ;;  %vm587_vm0 = vcmask 1041409   ;;  %vm589_vm1 = vcmask 1042434  }
  0x10   :  { %v968_v1 = vld [vmem:[#allocation5 + $0x78] sm:$0xff]  ;;  %722 = vmatpush.bf16.msra.mxu0 %v960_v0  ;;  %v967_v3 = vld [vmem:[#allocation5 + $0x70] sm:$0xff]  ;;  %v958_v4 = vld [vmem:[#allocation5 + $0x28] sm:$0xff]  ;;  %vm591_vm2 = vcmask 1043459   ;;  %vm593_vm3 = vcmask 1044484   ;;  %vm595_vm4 = vcmask 1045509  }
  0x11   :  { %736 = vmatpush.bf16.msra.mxu1 %v968_v1  ;;  %v966_v5 = vld [vmem:[#allocation5 + $0x68] sm:$0xff]  ;;  %v1139_v6 = vld [vmem:[#allocation2] sm:$0xff]  ;;  %v1143_v8 = vld [vmem:[#allocation2 + $0x10] sm:$0xff]  ;;  %vm597_vm5 = vcmask 1046534   ;;  %vm599_vm6 = vcmask 1047559   ;;  %s1096_s13 = smov [#allocation8]  }
  0x12   :  { %1417 = vst [vmem:[#allocation12_spill] sm:$0xff] %v1139_v6  ;;  %v1141_v7 = vld [vmem:[#allocation2 + $0x8] sm:$0xff]  ;;  %v1145_v9 = vld [vmem:[#allocation2 + $0x18] sm:$0xff]  ;;  %v1147_v10 = vld [vmem:[#allocation2 + $0x20] sm:$0xff]  ;;  %v103_v11 = vunpack.c.l.bf16 %v1139_v6  ;;  %v107_v16 = vunpack.c.l.bf16 %v1143_v8  ;;  %s843_s16 = sshll.u32 %s1398_s5, 4  ;;  %s844_s16 = int_to_ptr.hbm [resolvable:$true] %s843_s16 }
  0x13   :  { %1418 = vst [vmem:[#allocation13_spill] sm:$0xff] %v1141_v7  ;;  %v105_v12 = vunpack.c.l.bf16 %v1141_v7  ;;  %v1151_v13 = vld [vmem:[#allocation2 + $0x28] sm:$0xff]  ;;  %v1153_v14 = vld [vmem:[#allocation2 + $0x30] sm:$0xff]  ;;  %v1155_v15 = vld [vmem:[#allocation2 + $0x38] sm:$0xff]  ;;  %v109_v17 = vunpack.c.l.bf16 %v1145_v9  ;;  %v111_v23 = vunpack.c.l.bf16 %v1147_v10 }
  0x14   :  { %723 = vmatpush.bf16.msra.mxu0 %v959_v2  ;;  %1419 = vst [vmem:[#allocation14_spill] sm:$0xff] %v1143_v8  ;;  %v957_v18 = vld [vmem:[#allocation5 + $0x20] sm:$0xff]  ;;  %v1161_v21 = vld [vmem:[#allocation2 + $0x48] sm:$0xff]  ;;  %v1163_v22 = vld [vmem:[#allocation2 + $0x50] sm:$0xff]  ;;  %v113_v30 = vunpack.c.l.bf16 %v1151_v13  ;;  %v115_v31 = vunpack.c.l.bf16 %v1153_v14  ;;  %v117_v37 = vunpack.c.l.bf16 %v1155_v15 }
  0x15   :  { %737 = vmatpush.bf16.msra.mxu1 %v967_v3  ;;  %v965_v19 = vld [vmem:[#allocation5 + $0x60] sm:$0xff]  ;;  %v167_v24 = vadd.f32 %v105_v12, %v103_v11  ;;  %v1168_v27 = vld [vmem:[#allocation2 + $0x58] sm:$0xff]  ;;  %v1172_v29 = vld [vmem:[#allocation2 + $0x68] sm:$0xff]  ;;  %v181_v32 = vadd.f32 %v109_v17, %v107_v16  ;;  %v121_v39 = vunpack.c.l.bf16 %v1161_v21  ;;  %v123_v44 = vunpack.c.l.bf16 %v1163_v22 }
  0x16   :  { %v1159_v20 = vld [vmem:[#allocation2 + $0x40] sm:$0xff]  ;;  %v1177_v34 = vld [vmem:[#allocation2 + $0x70] sm:$0xff]  ;;  %v1179_v35 = vld [vmem:[#allocation2 + $0x78] sm:$0xff]  ;;  %v125_v45 = vunpack.c.l.bf16 %v1168_v27  ;;  %v129_v52 = vunpack.c.l.bf16 %v1172_v29  ;;  %v195_v26 = vadd.f32 %v113_v30, %v111_v23  ;;  %v209_v25 = vadd.f32 %v117_v37, %v115_v31 }
  0x17   :  { %v1170_v28 = vld [vmem:[#allocation2 + $0x60] sm:$0xff]  ;;  %v119_v38 = vunpack.c.l.bf16 %v1159_v20  ;;  %v168_v40 = vrot.slane %v167_v24, 4  ;;  %v1186_v41 = vld [vmem:[#allocation2 + $0x88] sm:$0xff]  ;;  %v1188_v42 = vld [vmem:[#allocation2 + $0x90] sm:$0xff]  ;;  %v182_v47 = vrot.slane %v181_v32, 4  ;;  %v131_v53 = vunpack.c.l.bf16 %v1177_v34 }
  0x18   :  { %724 = vmatpush.bf16.msra.mxu0 %v958_v4  ;;  %v1181_v36 = vld [vmem:[#allocation2 + $0x80] sm:$0xff]  ;;  %v1190_v43 = vld [vmem:[#allocation2 + $0x98] sm:$0xff]  ;;  %v127_v46 = vunpack.c.l.bf16 %v1170_v28  ;;  %v1197_v50 = vld [vmem:[#allocation2 + $0xa8] sm:$0xff]  ;;  %v133_v54 = vunpack.c.l.bf16 %v1179_v35  ;;  %v137_v60 = vunpack.c.l.bf16 %v1186_v41  ;;  %v139_v61 = vunpack.c.l.bf16 %v1188_v42 }
  0x19   :  { %738 = vmatpush.bf16.msra.mxu1 %v966_v5  ;;  %1420 = vst [vmem:[#allocation15_spill] sm:$0xff] %v1190_v43  ;;  %v956_v48 = vld [vmem:[#allocation5 + $0x18] sm:$0xff]  ;;  %v1195_v49 = vld [vmem:[#allocation2 + $0xa0] sm:$0xff]  ;;  %v1199_v51 = vld [vmem:[#allocation2 + $0xb0] sm:$0xff]  ;;  %v169_v55 = vadd.f32 %v168_v40, %v167_v24  ;;  %v135_v59 = vunpack.c.l.bf16 %v1181_v36  ;;  %v183_v62 = vadd.f32 %v182_v47, %v181_v32  ;;  %v141_v2 = vunpack.c.l.bf16 %v1190_v43 }
  0x1a   :  { %v1204_v56 = vld [vmem:[#allocation2 + $0xb8] sm:$0xff]  ;;  %v1206_v57 = vld [vmem:[#allocation2 + $0xc0] sm:$0xff]  ;;  %v1208_v58 = vld [vmem:[#allocation2 + $0xc8] sm:$0xff]  ;;  %v223_v11 = vadd.f32 %v121_v39, %v119_v38  ;;  %v237_v3 = vadd.f32 %v125_v45, %v123_v44  ;;  %v251_v8 = vadd.f32 %v129_v52, %v127_v46  ;;  %v265_v7 = vadd.f32 %v133_v54, %v131_v53 }
  0x1b   :  { %1421 = vst [vmem:[#allocation16_spill] sm:$0xff] %v1204_v56  ;;  %v964_v63 = vld [vmem:[#allocation5 + $0x58] sm:$0xff]  ;;  %v1213_v0 = vld [vmem:[#allocation2 + $0xd0] sm:$0xff]  ;;  %v170_v5 = vrot.slane %v169_v55, 2  ;;  %v184_v17 = vrot.slane %v183_v62, 2  ;;  %v1228_v47 = vld [vmem:[#allocation2 + $0xe8] sm:$0xff] }
  0x1c   :  { %1422 = vst [vmem:[#allocation17_spill] sm:$0xff] %v1206_v57  ;;  %725 = vmatpush.bf16.msra.mxu0 %v957_v18  ;;  %v1215_v1 = vld [vmem:[#allocation2 + $0xd8] sm:$0xff]  ;;  %v1223_v18 = vld [vmem:[#allocation2 + $0xe0] sm:$0xff]  ;;  %v955_v12 = vld [vmem:[#allocation5 + $0x10] sm:$0xff]  ;;  %v196_v24 = vrot.slane %v195_v26, 4  ;;  %v210_v6 = vrot.slane %v209_v25, 4 }
  0x1d   :  { %1423 = vst [vmem:[#allocation18_spill] sm:$0xff] %v1208_v58  ;;  %739 = vmatpush.bf16.msra.mxu1 %v965_v19  ;;  %v171_v40 = vadd.f32 %v170_v5, %v169_v55  ;;  %v185_v33 = vadd.f32 %v184_v17, %v183_v62  ;;  %v963_v16 = vld [vmem:[#allocation5 + $0x50] sm:$0xff]  ;;  %v224_v32 = vrot.slane %v223_v11, 4  ;;  %v161_v55 = vunpack.c.l.bf16 %v1228_v47  ;;  %v954_v39 = vld [vmem:[#allocation5 + $0x8] sm:$0xff] }
  0x1e   :  { %1424 = vst [vmem:[#allocation19_spill] sm:$0xff] %v1213_v0  ;;  %v238_v5 = vrot.slane %v237_v3, 4  ;;  %v252_v62 = vrot.slane %v251_v8, 4  ;;  %v266_v23 = vrot.slane %v265_v7, 4  ;;  %v197_v31 = vadd.f32 %v196_v24, %v195_v26  ;;  %v962_v44 = vld [vmem:[#allocation5 + $0x48] sm:$0xff]  ;;  %v1232_v19 = vld [vmem:[#allocation2 + $0xf0] sm:$0xff] }
  0x1f   :  { %1425 = vst [vmem:[#allocation20_spill] sm:$0xff] %v1215_v1  ;;  %v172_v4 = vrot.slane %v171_v40, 1  ;;  %v211_v37 = vadd.f32 %v210_v6, %v209_v25  ;;  %v225_v38 = vadd.f32 %v224_v32, %v223_v11  ;;  %v186_v45 = vrot.slane %v185_v33, 1  ;;  %v1234_v6 = vld [vmem:[#allocation2 + $0xf8] sm:$0xff] }
  0x20   :  { %1426 = vst [vmem:[#allocation21_spill] sm:$0xff] %v1223_v18  ;;  %726 = vmatpush.bf16.msra.mxu0 %v956_v48  ;;  %v239_v46 = vadd.f32 %v238_v5, %v237_v3  ;;  %v253_v48 = vadd.f32 %v252_v62, %v251_v8  ;;  %v267_v52 = vadd.f32 %v266_v23, %v265_v7  ;;  %v198_v53 = vrot.slane %v197_v31, 2  ;;  %v953_v8 = vld [vmem:[#allocation5] sm:$0xff] }
  0x21   :  { %1427 = vst [vmem:[#allocation22_spill] sm:$0xff] %v1228_v47  ;;  %740 = vmatpush.bf16.msra.mxu1 %v964_v63  ;;  %v173_v30 = vadd.f32 %v172_v4, %v171_v40  ;;  %v212_v54 = vrot.slane %v211_v37, 2  ;;  %v226_v63 = vrot.slane %v225_v38, 2  ;;  %v279_v17 = vadd.f32 %v137_v60, %v135_v59  ;;  %v961_v7 = vld [vmem:[#allocation5 + $0x40] sm:$0xff] }
  0x22   :  { %1428 = vst [vmem:[#allocation23_spill] sm:$0xff] %v1232_v19  ;;  %v240_v47 = vrot.slane %v239_v46, 2  ;;  %v254_v43 = vrot.slane %v253_v48, 2  ;;  %v268_v4 = vrot.slane %v267_v52, 2  ;;  %v293_v26 = vadd.f32 %v141_v2, %v139_v61 }
  0x23   :  { %1429 = vst [vmem:[#allocation24_spill] sm:$0xff] %v1234_v6  ;;  %v199_v25 = vadd.f32 %v198_v53, %v197_v31  ;;  %v213_v11 = vadd.f32 %v212_v54, %v211_v37  ;;  %v163_v60 = vunpack.c.l.bf16 %v1232_v19  ;;  %v165_v61 = vunpack.c.l.bf16 %v1234_v6 }
  0x24   :  { %727 = vmatpush.bf16.msra.mxu0 %v955_v12  ;;  %v227_v12 = vadd.f32 %v226_v63, %v225_v38  ;;  %v241_v3 = vadd.f32 %v240_v47, %v239_v46  ;;  %v255_v24 = vadd.f32 %v254_v43, %v253_v48  ;;  %v269_v32 = vadd.f32 %v268_v4, %v267_v52 }
  0x25   :  { %741 = vmatpush.bf16.msra.mxu1 %v963_v16  ;;  %v280_v16 = vrot.slane %v279_v17, 4  ;;  %v294_v59 = vrot.slane %v293_v26, 4  ;;  %v200_v40 = vrot.slane %v199_v25, 1  ;;  %v214_v5 = vrot.slane %v213_v11, 1 }
  0x26   :  { %v187_v2 = vadd.f32 %v186_v45, %v185_v33  ;;  %v1238_v31 = vmul.f32 0.0625, %v173_v30  ;;  %v228_v37 = vrot.slane %v227_v12, 1  ;;  %v242_v38 = vrot.slane %v241_v3, 1 }
  0x27   :  { %v281_v62 = vadd.f32 %v280_v16, %v279_v17  ;;  %v295_v23 = vadd.f32 %v294_v59, %v293_v26  ;;  %v201_v43 = vadd.f32 %v200_v40, %v199_v25  ;;  %v215_v47 = vadd.f32 %v214_v5, %v213_v11 }
  0x28   :  { %728 = vmatpush.bf16.msra.mxu0 %v954_v39  ;;  %v256_v39 = vrot.slane %v255_v24, 1  ;;  %v270_v46 = vrot.slane %v269_v32, 1  ;;  %v1430_v53 = vunpack.c.l.bf16 %v1195_v49  ;;  %v1431_v54 = vunpack.c.l.bf16 %v1197_v50 }
  0x29   :  { %742 = vmatpush.bf16.msra.mxu1 %v962_v44  ;;  %v282_v44 = vrot.slane %v281_v62, 2  ;;  %v296_v48 = vrot.slane %v295_v23, 2  ;;  %v1432_v33 = vunpack.c.l.bf16 %v1199_v51  ;;  %v1433_v30 = vunpack.c.l.bf16 %v1204_v56 }
  0x2a   :  { %v307_v63 = vadd.f32 %v1431_v54, %v1430_v53  ;;  %v1434_v17 = vunpack.c.l.bf16 %v1206_v57  ;;  %v1435_v4 = vunpack.c.l.bf16 %v1208_v58  ;;  %v1436_v11 = vunpack.c.l.bf16 %v1213_v0 }
  0x2b   :  { %v283_v52 = vadd.f32 %v282_v44, %v281_v62  ;;  %v321_v45 = vadd.f32 %v1433_v30, %v1432_v33  ;;  %v297_v25 = vadd.f32 %v296_v48, %v295_v23  ;;  %v1437_v16 = vunpack.c.l.bf16 %v1215_v1 }
  0x2c   :  { %729 = vmatpush.bf16.msra.mxu0 %v953_v8  ;;  %v335_v26 = vadd.f32 %v1435_v4, %v1434_v17  ;;  %v377_v40 = vadd.f32 %v165_v61, %v163_v60  ;;  %v229_v5 = vadd.f32 %v228_v37, %v227_v12  ;;  %v308_v62 = vrot.slane %v307_v63, 4 }
  0x2d   :  { %743 = vmatpush.bf16.msra.mxu1 %v961_v7  ;;  %v349_v8 = vadd.f32 %v1437_v16, %v1436_v11  ;;  %v1438_v7 = vunpack.c.l.bf16 %v1223_v18  ;;  %v322_v44 = vrot.slane %v321_v45, 4  ;;  %v243_v54 = vadd.f32 %v242_v38, %v241_v3 }
  0x2e   :  { %v336_v53 = vrot.slane %v335_v26, 4  ;;  %v378_v6 = vrot.slane %v377_v40, 4  ;;  %v284_v19 = vrot.slane %v283_v52, 1  ;;  %v309_v17 = vadd.f32 %v308_v62, %v307_v63 }
  0x2f   :  { %v363_v59 = vadd.f32 %v161_v55, %v1438_v7  ;;  %v350_v33 = vrot.slane %v349_v8, 4  ;;  %v323_v23 = vadd.f32 %v322_v44, %v321_v45  ;;  %v298_v4 = vrot.slane %v297_v25, 1 }
  0x30   :  { %v337_v48 = vadd.f32 %v336_v53, %v335_v26  ;;  %v379_v11 = vadd.f32 %v378_v6, %v377_v40  ;;  %v257_v16 = vadd.f32 %v256_v39, %v255_v24  ;;  %v310_v18 = vrot.slane %v309_v17, 2 }
  0x31   :  { %v364_v30 = vrot.slane %v363_v59, 4  ;;  %v351_v0 = vadd.f32 %v350_v33, %v349_v8  ;;  %v324_v55 = vrot.slane %v323_v23, 2  ;;  %v271_v12 = vadd.f32 %v270_v46, %v269_v32 }
  0x32   :  { %v338_v60 = vrot.slane %v337_v48, 2  ;;  %v380_v7 = vrot.slane %v379_v11, 2  ;;  %v285_v3 = vadd.f32 %v284_v19, %v283_v52  ;;  %v311_v38 = vadd.f32 %v310_v18, %v309_v17 }
  0x33   :  { %v365_v1 = vadd.f32 %v364_v30, %v363_v59  ;;  %v352_v61 = vrot.slane %v351_v0, 2  ;;  %v325_v58 = vadd.f32 %v324_v55, %v323_v23  ;;  %v299_v56 = vadd.f32 %v298_v4, %v297_v25 }
  0x34   :  { %v339_v57 = vadd.f32 %v338_v60, %v337_v48  ;;  %v381_v26 = vadd.f32 %v380_v7, %v379_v11  ;;  %v312_v62 = vrot.slane %v311_v38, 1  ;;  %v425_v6 = vmul.f32 0.0625, %v187_v2 }
  0x35   :  { %v366_v37 = vrot.slane %v365_v1, 2  ;;  %v353_v63 = vadd.f32 %v352_v61, %v351_v0  ;;  %v326_v8 = vrot.slane %v325_v58, 1  ;;  %v427_v44 = vmul.f32 0.0625, %v201_v43 }
  0x36   :  { %v340_v59 = vrot.slane %v339_v57, 1  ;;  %v382_v40 = vrot.slane %v381_v26, 1  ;;  %v313_v32 = vadd.f32 %v312_v62, %v311_v38  ;;  %v429_v33 = vmul.f32 0.0625, %v215_v47 }
  0x37   :  { %v367_v45 = vadd.f32 %v366_v37, %v365_v1  ;;  %v354_v24 = vrot.slane %v353_v63, 1  ;;  %v327_v46 = vadd.f32 %v326_v8, %v325_v58  ;;  %v431_v30 = vmul.f32 0.0625, %v229_v5 }
  0x38   :  { %v341_v53 = vadd.f32 %v340_v59, %v339_v57  ;;  %v383_v52 = vadd.f32 %v382_v40, %v381_v26  ;;  %v433_v25 = vmul.f32 0.0625, %v243_v54  ;;  %v435_v0 = vmul.f32 0.0625, %v257_v16 }
  0x39   :  { %v368_v39 = vrot.slane %v367_v45, 1  ;;  %v355_v19 = vadd.f32 %v354_v24, %v353_v63  ;;  %v439_v1 = vmul.f32 0.0625, %v285_v3  ;;  %v441_v17 = vmul.f32 0.0625, %v299_v56 }
  0x3a   :  { %v437_v23 = vmul.f32 0.0625, %v271_v12  ;;  %v443_v48 = vmul.f32 0.0625, %v313_v32  ;;  %v445_v4 = vmul.f32 0.0625, %v327_v46  ;;  %v447_v2 = vmul.f32 0.0625, %v341_v53 }
  0x3b   :  { %v369_v18 = vadd.f32 %v368_v39, %v367_v45  ;;  %v449_v11 = vmul.f32 0.0625, %v355_v19  ;;  %v455_v43 = vpack.c.bf16 %v1238_v31, %v1238_v31  ;;  %v457_v58 = vpack.c.bf16 %v425_v6, %v425_v6 }
  0x3c   :  { %v453_v57 = vmul.f32 0.0625, %v383_v52  ;;  %v459_v47 = vpack.c.bf16 %v427_v44, %v427_v44  ;;  %v461_v60 = vpack.c.bf16 %v429_v33, %v429_v33  ;;  %v463_v61 = vpack.c.bf16 %v431_v30, %v431_v30 }
  0x3d   :  { %v451_v55 = vmul.f32 0.0625, %v369_v18  ;;  %v465_v37 = vpack.c.bf16 %v433_v25, %v433_v25  ;;  %v467_v5 = vpack.c.bf16 %v435_v0, %v435_v0  ;;  %v471_v54 = vpack.c.bf16 %v439_v1, %v439_v1 }
  0x3e   :  { %v473_v16 = vpack.c.bf16 %v441_v17, %v441_v17  ;;  %v469_v7 = vpack.c.bf16 %v437_v23, %v437_v23  ;;  %v475_v56 = vpack.c.bf16 %v443_v48, %v443_v48  ;;  %v477_v12 = vpack.c.bf16 %v445_v4, %v445_v4 }
  0x3f   :  { %v479_v3 = vpack.c.bf16 %v447_v2, %v447_v2  ;;  %v481_v38 = vpack.c.bf16 %v449_v11, %v449_v11  ;;  %v483_v63 = vpack.c.bf16 %v451_v55, %v451_v55  ;;  %v555_v45 = vunpack.c.l.b16 %v455_v43 }
  0x40   :  { %v557_v26 = vunpack.c.l.b16 %v457_v58  ;;  %v485_v62 = vpack.c.bf16 %v453_v57, %v453_v57  ;;  %v559_v8 = vunpack.c.l.b16 %v459_v47  ;;  %v561_v31 = vunpack.c.l.b16 %v461_v60 }
  0x41   :  { %v563_v59 = vunpack.c.l.b16 %v463_v61  ;;  %v565_v6 = vunpack.c.l.b16 %v465_v37  ;;  %v567_v24 = vunpack.c.l.b16 %v467_v5  ;;  %v571_v39 = vunpack.c.l.b16 %v471_v54 }
  0x42   :  { %v573_v40 = vunpack.c.l.b16 %v473_v16  ;;  %v569_v44 = vunpack.c.l.b16 %v469_v7  ;;  %v575_v32 = vunpack.c.l.b16 %v475_v56  ;;  %v577_v46 = vunpack.c.l.b16 %v477_v12 }
  0x43   :  { %v588_v53 = vsel %vm587_vm0, %v557_v26, %v555_v45  ;;  %v579_v33 = vunpack.c.l.b16 %v479_v3  ;;  %v581_v19 = vunpack.c.l.b16 %v481_v38  ;;  %v583_v52 = vunpack.c.l.b16 %v483_v63  ;;  %v1441_v38 = vld [vmem:[#allocation17_spill] sm:$0xff]  ;;  %v1443_v26 = vld [vmem:[#allocation19_spill] sm:$0xff] }
  0x44   :  { %v590_v18 = vsel %vm589_vm1, %v559_v8, %v588_v53  ;;  %v608_v25 = vsel %vm587_vm0, %v573_v40, %v571_v39  ;;  %v585_v0 = vunpack.c.l.b16 %v485_v62  ;;  %v110_v4 = vunpack.c.h.bf16 %v1145_v9  ;;  %v1444_v8 = vld [vmem:[#allocation20_spill] sm:$0xff] }
  0x45   :  { %v592_v30 = vsel %vm591_vm2, %v561_v31, %v590_v18  ;;  %v609_v17 = vsel %vm589_vm1, %v575_v32, %v608_v25  ;;  %v112_v2 = vunpack.c.h.bf16 %v1147_v10  ;;  %v114_v43 = vunpack.c.h.bf16 %v1151_v13 }
  0x46   :  { %v594_v1 = vsel %vm593_vm3, %v563_v59, %v592_v30  ;;  %v610_v48 = vsel %vm591_vm2, %v577_v46, %v609_v17  ;;  %v116_v58 = vunpack.c.h.bf16 %v1153_v14  ;;  %v118_v60 = vunpack.c.h.bf16 %v1155_v15  ;;  %v1445_v59 = vld [vmem:[#allocation12_spill] sm:$0xff] }
  0x47   :  { %v596_v23 = vsel %vm595_vm4, %v565_v6, %v594_v1  ;;  %v611_v55 = vsel %vm593_vm3, %v579_v33, %v610_v48  ;;  %v120_v61 = vunpack.c.h.bf16 %v1159_v20  ;;  %v122_v10 = vunpack.c.h.bf16 %v1161_v21 }
  0x48   :  { %v598_v11 = vsel %vm597_vm5, %v567_v24, %v596_v23  ;;  %v612_v47 = vsel %vm595_vm4, %v581_v19, %v611_v55  ;;  %v124_v37 = vunpack.c.h.bf16 %v1163_v22  ;;  %v126_v5 = vunpack.c.h.bf16 %v1168_v27  ;;  %v1439_v22 = vld [vmem:[#allocation15_spill] sm:$0xff]  ;;  %v1447_v24 = vld [vmem:[#allocation13_spill] sm:$0xff] }
  0x49   :  { %v600_v57 = vsel %vm599_vm6, %v569_v44, %v598_v11  ;;  %v613_v9 = vsel %vm597_vm5, %v583_v52, %v612_v47  ;;  %v128_v14 = vunpack.c.h.bf16 %v1170_v28  ;;  %v130_v54 = vunpack.c.h.bf16 %v1172_v29  ;;  %v1440_v29 = vld [vmem:[#allocation16_spill] sm:$0xff]  ;;  %v1449_v44 = vld [vmem:[#allocation14_spill] sm:$0xff] }
  0x4a   :  { %v614_v13 = vsel %vm599_vm6, %v585_v0, %v613_v9  ;;  %v132_v16 = vunpack.c.h.bf16 %v1177_v34  ;;  %v134_v15 = vunpack.c.h.bf16 %v1179_v35  ;;  %v136_v20 = vunpack.c.h.bf16 %v1181_v36  ;;  %v1442_v35 = vld [vmem:[#allocation18_spill] sm:$0xff] }
  0x4b   :  { %v622_v7 = vpack.c.b16 %v614_v13, %v600_v57  ;;  %v138_v56 = vunpack.c.h.bf16 %v1186_v41  ;;  %v140_v21 = vunpack.c.h.bf16 %v1188_v42  ;;  %v142_v12 = vunpack.c.h.bf16 %v1439_v22 }
  0x4c   :  { %v144_v27 = vunpack.c.h.bf16 %v1195_v49  ;;  %v146_v3 = vunpack.c.h.bf16 %v1197_v50  ;;  %v148_v28 = vunpack.c.h.bf16 %v1199_v51  ;;  %v150_v34 = vunpack.c.h.bf16 %v1440_v29  ;;  %v976_v51 = vld [vmem:[#allocation7 + $0x38] sm:$0xff] }
  0x4d   :  { %730 = vmatmul.bf16.vlgmr.msra.gmra.mxu0 %v622_v7  ;;  %v152_v63 = vunpack.c.h.bf16 %v1441_v38  ;;  %v154_v45 = vunpack.c.h.bf16 %v1442_v35  ;;  %v156_v62 = vunpack.c.h.bf16 %v1443_v26  ;;  %v158_v31 = vunpack.c.h.bf16 %v1444_v8  ;;  %821 = vmatpush.bf16.msra.mxu2 %v976_v51 }
  0x4e   :  { %v1446_v6 = vunpack.c.h.bf16 %v1445_v59  ;;  %v1448_v39 = vunpack.c.h.bf16 %v1447_v24  ;;  %v1450_v32 = vunpack.c.h.bf16 %v1449_v44  ;;  %v202_v53 = vadd.f32 %v114_v43, %v112_v2 }
  0x4f   :  { %v216_v33 = vadd.f32 %v118_v60, %v116_v58  ;;  %v230_v19 = vadd.f32 %v122_v10, %v120_v61  ;;  %v244_v18 = vadd.f32 %v126_v5, %v124_v37  ;;  %v258_v25 = vadd.f32 %v130_v54, %v128_v14 }
  0x50   :  { %v174_v40 = vadd.f32 %v1448_v39, %v1446_v6  ;;  %v188_v46 = vadd.f32 %v110_v4, %v1450_v32  ;;  %v272_v0 = vadd.f32 %v134_v15, %v132_v16  ;;  %v203_v1 = vrot.slane %v202_v53, 4 }
  0x51   :  { %v217_v17 = vrot.slane %v216_v33, 4  ;;  %v231_v23 = vrot.slane %v230_v19, 4  ;;  %v245_v48 = vrot.slane %v244_v18, 4  ;;  %v259_v57 = vrot.slane %v258_v25, 4 }
  0x52   :  { %v175_v52 = vrot.slane %v174_v40, 4  ;;  %v189_v30 = vrot.slane %v188_v46, 4  ;;  %v273_v47 = vrot.slane %v272_v0, 4  ;;  %v204_v9 = vadd.f32 %v203_v1, %v202_v53 }
  0x53   :  { %v218_v13 = vadd.f32 %v217_v17, %v216_v33  ;;  %v232_v7 = vadd.f32 %v231_v23, %v230_v19  ;;  %v246_v4 = vadd.f32 %v245_v48, %v244_v18  ;;  %v260_v58 = vadd.f32 %v259_v57, %v258_v25  ;;  %v1452_v33 = vld [vmem:[#allocation22_spill] sm:$0xff] }
  0x54   :  { %v176_v11 = vadd.f32 %v175_v52, %v174_v40  ;;  %v190_v55 = vadd.f32 %v189_v30, %v188_v46  ;;  %v274_v60 = vadd.f32 %v273_v47, %v272_v0  ;;  %v205_v61 = vrot.slane %v204_v9, 2  ;;  %v1451_v46 = vld [vmem:[#allocation21_spill] sm:$0xff]  ;;  %v1453_v30 = vld [vmem:[#allocation23_spill] sm:$0xff]  ;;  %v1454_v0 = vld [vmem:[#allocation24_spill] sm:$0xff] }
  0x55   :  { %v219_v10 = vrot.slane %v218_v13, 2  ;;  %v233_v37 = vrot.slane %v232_v7, 2  ;;  %v247_v5 = vrot.slane %v246_v4, 2  ;;  %v261_v16 = vrot.slane %v260_v58, 2 }
  0x56   :  { %v177_v2 = vrot.slane %v176_v11, 2  ;;  %v191_v43 = vrot.slane %v190_v55, 2  ;;  %v275_v15 = vrot.slane %v274_v60, 2  ;;  %v206_v8 = vadd.f32 %v205_v61, %v204_v9 }
  0x57   :  { %v220_v59 = vadd.f32 %v219_v10, %v218_v13  ;;  %v1305_v6 = vadd.f32 %v233_v37, %v232_v7  ;;  %v1307_v24 = vadd.f32 %v247_v5, %v246_v4  ;;  %v1309_v44 = vadd.f32 %v261_v16, %v260_v58 }
  0x58   :  { %v178_v14 = vadd.f32 %v177_v2, %v176_v11  ;;  %v192_v54 = vadd.f32 %v191_v43, %v190_v55  ;;  %v1311_v32 = vadd.f32 %v275_v15, %v274_v60  ;;  %v160_v53 = vunpack.c.h.bf16 %v1451_v46 }
  0x59   :  { %v162_v19 = vunpack.c.h.bf16 %v1452_v33  ;;  %v207_v18 = vrot.slane %v206_v8, 1  ;;  %v221_v52 = vrot.slane %v220_v59, 1  ;;  %v164_v25 = vunpack.c.h.bf16 %v1453_v30 }
  0x5a   :  { %v179_v39 = vrot.slane %v178_v14, 1  ;;  %v193_v40 = vrot.slane %v192_v54, 1  ;;  %v166_v1 = vunpack.c.h.bf16 %v1454_v0  ;;  %v235_v17 = vrot.slane %v1305_v6, 1 }
  0x5b   :  { %v249_v23 = vrot.slane %v1307_v24, 1  ;;  %v263_v55 = vrot.slane %v1309_v44, 1  ;;  %v277_v57 = vrot.slane %v1311_v32, 1  ;;  %v1325_v47 = vadd.f32 %v207_v18, %v206_v8 }
  0x5c   :  { %v1319_v48 = vadd.f32 %v179_v39, %v178_v14  ;;  %v1321_v11 = vadd.f32 %v193_v40, %v192_v54  ;;  %v1327_v9 = vadd.f32 %v221_v52, %v220_v59  ;;  %v286_v13 = vadd.f32 %v138_v56, %v136_v20  ;;  %v974_v39 = vld [vmem:[#allocation7 + $0x28] sm:$0xff] }
  0x5d   :  { %v300_v7 = vadd.f32 %v142_v12, %v140_v21  ;;  %v314_v4 = vadd.f32 %v146_v3, %v144_v27  ;;  %v328_v2 = vadd.f32 %v150_v34, %v148_v28  ;;  %v342_v36 = vadd.f32 %v154_v45, %v152_v63  ;;  %v975_v45 = vld [vmem:[#allocation7 + $0x30] sm:$0xff] }
  0x5e   :  { %v356_v41 = vadd.f32 %v158_v31, %v156_v62  ;;  %v287_v42 = vrot.slane %v286_v13, 4  ;;  %v370_v56 = vadd.f32 %v162_v19, %v160_v53  ;;  %v384_v49 = vadd.f32 %v166_v1, %v164_v25  ;;  %822 = vmatpush.bf16.msra.mxu2 %v975_v45 }
  0x5f   :  { %v301_v20 = vrot.slane %v300_v7, 4  ;;  %v315_v21 = vrot.slane %v314_v4, 4  ;;  %v329_v50 = vrot.slane %v328_v2, 4  ;;  %v343_v22 = vrot.slane %v342_v36, 4 }
  0x60   :  { %v357_v12 = vrot.slane %v356_v41, 4  ;;  %v288_v27 = vadd.f32 %v287_v42, %v286_v13  ;;  %v371_v28 = vrot.slane %v370_v56, 4  ;;  %v385_v29 = vrot.slane %v384_v49, 4 }
  0x61   :  { %v302_v3 = vadd.f32 %v301_v20, %v300_v7  ;;  %v316_v34 = vadd.f32 %v315_v21, %v314_v4  ;;  %v330_v38 = vadd.f32 %v329_v50, %v328_v2  ;;  %v344_v35 = vadd.f32 %v343_v22, %v342_v36 }
  0x62   :  { %v358_v63 = vadd.f32 %v357_v12, %v356_v41  ;;  %v289_v26 = vrot.slane %v288_v27, 2  ;;  %v372_v31 = vadd.f32 %v371_v28, %v370_v56  ;;  %v386_v43 = vadd.f32 %v385_v29, %v384_v49  ;;  %823 = vmatpush.bf16.msra.mxu2 %v974_v39  ;;  %v973_v41 = vld [vmem:[#allocation7 + $0x20] sm:$0xff] }
  0x63   :  { %v303_v62 = vrot.slane %v302_v3, 2  ;;  %v317_v58 = vrot.slane %v316_v34, 2  ;;  %v331_v60 = vrot.slane %v330_v38, 2  ;;  %v345_v61 = vrot.slane %v344_v35, 2 }
  0x64   :  { %v359_v10 = vrot.slane %v358_v63, 2  ;;  %v290_v37 = vadd.f32 %v289_v26, %v288_v27  ;;  %v373_v14 = vrot.slane %v372_v31, 2  ;;  %v387_v54 = vrot.slane %v386_v43, 2 }
  0x65   :  { %v304_v5 = vadd.f32 %v303_v62, %v302_v3  ;;  %v318_v16 = vadd.f32 %v317_v58, %v316_v34  ;;  %v332_v15 = vadd.f32 %v331_v60, %v330_v38  ;;  %v346_v8 = vadd.f32 %v345_v61, %v344_v35 }
  0x66   :  { %v360_v59 = vadd.f32 %v359_v10, %v358_v63  ;;  %v291_v40 = vrot.slane %v290_v37, 1  ;;  %v374_v53 = vadd.f32 %v373_v14, %v372_v31  ;;  %v388_v33 = vadd.f32 %v387_v54, %v386_v43  ;;  %824 = vmatpush.bf16.msra.mxu2 %v973_v41 }
  0x67   :  { %v305_v46 = vrot.slane %v304_v5, 1  ;;  %v319_v19 = vrot.slane %v318_v16, 1  ;;  %v333_v18 = vrot.slane %v332_v15, 1  ;;  %v347_v52 = vrot.slane %v346_v8, 1 }
  0x68   :  { %v361_v30 = vrot.slane %v360_v59, 1  ;;  %v292_v25 = vadd.f32 %v291_v40, %v290_v37  ;;  %v375_v1 = vrot.slane %v374_v53, 1  ;;  %v389_v13 = vrot.slane %v388_v33, 1 }
  0x69   :  { %v306_v0 = vadd.f32 %v305_v46, %v304_v5  ;;  %v236_v7 = vadd.f32 %v235_v17, %v1305_v6  ;;  %v320_v4 = vadd.f32 %v319_v19, %v318_v16  ;;  %v334_v2 = vadd.f32 %v333_v18, %v332_v15 }
  0x6a   :  { %v348_v36 = vadd.f32 %v347_v52, %v346_v8  ;;  %v250_v42 = vadd.f32 %v249_v23, %v1307_v24  ;;  %v362_v20 = vadd.f32 %v361_v30, %v360_v59  ;;  %v424_v56 = vmul.f32 0.0625, %v1319_v48 }
  0x6b   :  { %v426_v49 = vmul.f32 0.0625, %v1321_v11  ;;  %v264_v21 = vadd.f32 %v263_v55, %v1309_v44  ;;  %v278_v6 = vadd.f32 %v277_v57, %v1311_v32  ;;  %v376_v17 = vadd.f32 %v375_v1, %v374_v53 }
  0x6c   :  { %v428_v50 = vmul.f32 0.0625, %v1325_v47  ;;  %v390_v22 = vadd.f32 %v389_v13, %v388_v33  ;;  %v430_v12 = vmul.f32 0.0625, %v1327_v9  ;;  %v440_v24 = vmul.f32 0.0625, %v292_v25 }
  0x6d   :  { %v442_v23 = vmul.f32 0.0625, %v306_v0  ;;  %v432_v51 = vmul.f32 0.0625, %v236_v7  ;;  %v444_v48 = vmul.f32 0.0625, %v320_v4  ;;  %v446_v27 = vmul.f32 0.0625, %v334_v2 }
  0x6e   :  { %v448_v11 = vmul.f32 0.0625, %v348_v36  ;;  %v434_v3 = vmul.f32 0.0625, %v250_v42  ;;  %v450_v28 = vmul.f32 0.0625, %v362_v20  ;;  %v456_v44 = vpack.c.bf16 %v424_v56, %v424_v56 }
  0x6f   :  { %v458_v55 = vpack.c.bf16 %v426_v49, %v426_v49  ;;  %v436_v29 = vmul.f32 0.0625, %v264_v21  ;;  %v438_v34 = vmul.f32 0.0625, %v278_v6  ;;  %v452_v32 = vmul.f32 0.0625, %v376_v17  ;;  %v972_v6 = vld [vmem:[#allocation7 + $0x18] sm:$0xff]  ;;  %v971_v17 = vld [vmem:[#allocation7 + $0x10] sm:$0xff] }
  0x70   :  { %v460_v57 = vpack.c.bf16 %v428_v50, %v428_v50  ;;  %v454_v38 = vmul.f32 0.0625, %v390_v22  ;;  %v462_v47 = vpack.c.bf16 %v430_v12, %v430_v12  ;;  %v472_v35 = vpack.c.bf16 %v440_v24, %v440_v24  ;;  %825 = vmatpush.bf16.msra.mxu2 %v972_v6  ;;  %v970_v50 = vld [vmem:[#allocation7 + $0x8] sm:$0xff]  ;;  %v969_v22 = vld [vmem:[#allocation7] sm:$0xff] }
  0x71   :  { %v474_v63 = vpack.c.bf16 %v442_v23, %v442_v23  ;;  %v464_v9 = vpack.c.bf16 %v432_v51, %v432_v51  ;;  %v476_v45 = vpack.c.bf16 %v444_v48, %v444_v48  ;;  %v478_v26 = vpack.c.bf16 %v446_v27, %v446_v27  ;;  %v985_v24 = vld [vmem:[%s1395_s2] ss:$0 sm:$0xff]  ;;  %s841_s2 = sshll.u32 %s1096_s13, 4  ;;  %s842_s2 = int_to_ptr.vmem [resolvable:$true] %s841_s2 }
  0x72   :  { %v480_v62 = vpack.c.bf16 %v448_v11, %v448_v11  ;;  %v466_v31 = vpack.c.bf16 %v434_v3, %v434_v3  ;;  %v482_v43 = vpack.c.bf16 %v450_v28, %v450_v28  ;;  %v556_v58 = vunpack.c.l.b16 %v456_v44 }
  0x73   :  { %v558_v60 = vunpack.c.l.b16 %v458_v55  ;;  %v468_v61 = vpack.c.bf16 %v436_v29, %v436_v29  ;;  %v470_v10 = vpack.c.bf16 %v438_v34, %v438_v34  ;;  %v484_v37 = vpack.c.bf16 %v452_v32, %v452_v32  ;;  %v986_v34 = vld [vmem:[%s1397_s4] ss:$0 sm:$0xff] }
  0x74   :  { %v560_v5 = vunpack.c.l.b16 %v460_v57  ;;  %v486_v14 = vpack.c.bf16 %v454_v38, %v454_v38  ;;  %v562_v54 = vunpack.c.l.b16 %v462_v47  ;;  %v572_v16 = vunpack.c.l.b16 %v472_v35  ;;  %826 = vmatpush.bf16.msra.mxu2 %v971_v17 }
  0x75   :  { %v574_v15 = vunpack.c.l.b16 %v474_v63  ;;  %v564_v8 = vunpack.c.l.b16 %v464_v9  ;;  %v576_v59 = vunpack.c.l.b16 %v476_v45  ;;  %v578_v39 = vunpack.c.l.b16 %v478_v26 }
  0x76   :  { %v580_v40 = vunpack.c.l.b16 %v480_v62  ;;  %v566_v46 = vunpack.c.l.b16 %v466_v31  ;;  %v582_v53 = vunpack.c.l.b16 %v482_v43  ;;  %v601_v33 = vsel %vm587_vm0, %v558_v60, %v556_v58 }
  0x77   :  { %v615_v19 = vsel %vm587_vm0, %v574_v15, %v572_v16  ;;  %v568_v18 = vunpack.c.l.b16 %v468_v61  ;;  %v584_v52 = vunpack.c.l.b16 %v484_v37  ;;  %v602_v30 = vsel %vm589_vm1, %v560_v5, %v601_v33 }
  0x78   :  { %v616_v25 = vsel %vm589_vm1, %v576_v59, %v615_v19  ;;  %v570_v0 = vunpack.c.l.b16 %v470_v10  ;;  %v586_v1 = vunpack.c.l.b16 %v486_v14  ;;  %v603_v13 = vsel %vm591_vm2, %v562_v54, %v602_v30  ;;  %827 = vmatpush.bf16.msra.mxu2 %v970_v50 }
  0x79   :  { %v617_v7 = vsel %vm591_vm2, %v578_v39, %v616_v25  ;;  %v604_v4 = vsel %vm593_vm3, %v564_v8, %v603_v13 }
  0x7a   :  { %v618_v2 = vsel %vm593_vm3, %v580_v40, %v617_v7  ;;  %v605_v36 = vsel %vm595_vm4, %v566_v46, %v604_v4 }
  0x7b   :  { %v619_v41 = vsel %vm595_vm4, %v582_v53, %v618_v2  ;;  %v606_v42 = vsel %vm597_vm5, %v568_v18, %v605_v36 }
  0x7c   :  { %v620_v20 = vsel %vm597_vm5, %v584_v52, %v619_v41  ;;  %v607_v56 = vsel %vm599_vm6, %v570_v0, %v606_v42  ;;  %828 = vmatpush.bf16.msra.mxu2 %v969_v22 }
  0x7d   :  { %v621_v49 = vsel %vm599_vm6, %v586_v1, %v620_v20 }
  0x7e   :  { %v623_v21 = vpack.c.b16 %v621_v49, %v607_v56 }
  0x80   :  { %744 = vmatmul.bf16.vlgmr.msra.gmra.mxu1 %v623_v21 }
  0xca   :  { %v731_v12 = vpop.f32.mrf.mxu0 }
  0xcb   :  { %v732_v48 = vadd.f32 %v985_v24, %v731_v12 }
  0xd2   :  { %v733_v51 = vpop.f32.mrf.mxu0 }
  0xd3   :  { %v734_v27 = vadd.f32 %v985_v24, %v733_v51 }
  0xfd   :  { %v745_v23 = vpop.f32.mrf.mxu1 }
  0xfe   :  { %v746_v11 = vadd.f32 %v745_v23, %v732_v48 }
 0x100   :  { %v750_v44 = vmax.f32 %v746_v11, 0.0 }
 0x105   :  { %v747_v3 = vpop.f32.mrf.mxu1 }
 0x106   :  { %v748_v28 = vadd.f32 %v747_v3, %v734_v27 }
 0x108   :  { %v751_v55 = vmax.f32 %v748_v28, 0.0 }
 0x10a   :  { %v752_v29 = vpack.c.bf16 %v751_v55, %v750_v44 }
 0x10c   :  { %829 = vmatmul.bf16.vlgmr.msra.gmra.mxu2 %v752_v29 }
 0x18f   :  { %v830_v32 = vpop.f32.mrf.mxu2 }
 0x190   :  { %v831_v57 = vadd.f32 %v986_v34, %v830_v32 }
 0x192   :  { %835 = vst [vmem:[#allocation8] sm:$0xff] %v831_v57 }
 0x197   :  { %v832_v38 = vpop.f32.mrf.mxu2 }
 0x198   :  { %v833_v47 = vadd.f32 %v986_v34, %v832_v38 }
 0x19a   :  { %836 = vst [vmem:[#allocation8 + $0x8] sm:$0xff] %v833_v47 }
 0x19b   :  { %849 = dma.vmem_to_hbm [thread:$0]  %s842_s2, 256, %s844_s16, [#allocation4], %s1093_s30, %s1093_s30, %s1094_s6  }
 0x19c   :  { %1087 = dma.done.wait [#allocation4], 256  }
 0x19d   :  { %1088 = vsyncadd [#allocation4], 4294967040 }
 0x19e   :  { %854 = vsyncpa [#allocation3], 1 }
 0x19f   :  { %855 = vsyncpa [#allocation6], 1 }
 0x1a0   :  { %856 = vsyncpa [#allocation4], 1 }

</bundles_post_ra>
